<compile_context>
chip_gen: v5e
topology: v5e:2x2
jax: 0.10.0
libtpu: 0.0.40
codegen_flags: <defaults>
</compile_context>

<pallas_src>
import jax
import jax.numpy as jnp
from jax.experimental import pallas as pl
from jax.experimental.pallas import tpu as pltpu


def _normalize_kernel(x_ref, sb_ref, o_ref):
    # x_ref:  (R_TILE, L_TILE) VMEM block of the flattened (B*C, H*W) input.
    # sb_ref: (R_TILE, 2) per-row [scale, bias] constants.
    x = jnp.clip(x_ref[...], 0.0, 1.0)
    scale = sb_ref[:, 0:1]          # (R_TILE, 1) -> lane-broadcast
    bias = sb_ref[:, 1:2]           # (R_TILE, 1)
    o_ref[...] = x * scale + bias


def _cdiv(a, b):
    return -(-a // b)


def _round_up(a, m):
    return _cdiv(a, m) * m


def input_normalize(x, new_mean, new_std):
    """x: (B, C, H, W) float; new_mean/new_std: (C,) float."""
    B, C, H, W = x.shape
    N, L = B * C, H * W
    dtype = x.dtype
    itemsize = jnp.dtype(dtype).itemsize

    # Fold the divide into precomputed per-channel scale/bias:
    #   y = clip(x) * (1/std) + (-mean/std)
    scale_c = (1.0 / new_std).astype(dtype)           # (C,)
    bias_c = (-new_mean / new_std).astype(dtype)      # (C,)
    # One (scale, bias) pair per row of the flattened (B*C, H*W) view.
    sb = jnp.stack([jnp.tile(scale_c, B), jnp.tile(bias_c, B)], axis=-1)  # (N, 2)

    # Free reshape for contiguous NCHW: lane-dense last dim.
    x2d = x.reshape(N, L)

    # --- fixed ~8 MiB blocks; ragged edges handled by pl.cdiv grid -----------
    BLOCK_BYTES = 8 * 1024 * 1024
    block_elems = max(1, BLOCK_BYTES // itemsize)

    # Lane tile: full L if it fits (fully contiguous DMA rows), otherwise the
    # largest 128-multiple chunk that still leaves >= 8 sublanes of budget.
    lane_cap = max(128, ((block_elems // 8) // 128) * 128)
    l_tile = L if L <= lane_cap else lane_cap
    # TODO(synk): if H*W is not a multiple of 128, the output lane dim forces
    # masked partial stores; pad W (or the flattened L) upstream if that shape
    # ever becomes hot.

    # Row tile: fill the byte budget, multiple of 8 sublanes (or the full N).
    r_budget = max(8, block_elems // max(l_tile, 1))
    r_tile = (min(N, r_budget) // 8) * 8
    if r_tile <= 0 or r_tile >= N:
        r_tile = N                          # full rows: always a legal block extent

    # v7x 2-TensorCore balance: keep the leading "parallel" (row) grid axis at
    # an even block count when there are enough rows to split.
    if N >= 16:
        gr = _cdiv(N, r_tile)
        if gr % 2 == 1:
            nt = _round_up(_cdiv(N, gr + 1), 8)
            if 8 <= nt < N:
                r_tile = nt

    grid = (pl.cdiv(N, r_tile), pl.cdiv(L, l_tile))

    cost = pl.CostEstimate(
        flops=4 * N * L,                                    # clamp + mul + add
        transcendentals=0,
        bytes_accessed=2 * N * L * itemsize + sb.size * itemsize,
    )

    out2d = pl.pallas_call(
        _normalize_kernel,
        out_shape=jax.ShapeDtypeStruct((N, L), dtype),
        grid=grid,
        in_specs=[
            pl.BlockSpec((r_tile, l_tile), lambda i, j: (i, j)),
            # Per-row constants: block index constant over the inner lane axis,
            # so they are only re-fetched when the row block changes.
            pl.BlockSpec((r_tile, 2), lambda i, j: (i, 0)),
        ],
        out_specs=pl.BlockSpec((r_tile, l_tile), lambda i, j: (i, j)),
        compiler_params=pltpu.CompilerParams(
            dimension_semantics=("parallel", "parallel"),
            vmem_limit_bytes=48 * 1024 * 1024,
        ),
        cost_estimate=cost,
    )(x2d, sb)

    return out2d.reshape(B, C, H, W)


if __name__ == "__main__":
    B, C, H, W = 2, 4, 16, 16

    # Deterministic "buffer" initialization (module __init__ takes (C,) tensors).
    new_mean = jnp.array([0.485, 0.456, 0.406, 0.5], dtype=jnp.float32)
    new_std = jnp.array([0.229, 0.224, 0.225, 0.25], dtype=jnp.float32)

    key = jax.random.PRNGKey(0)
    # Range slightly outside [0, 1] so the clamp is exercised.
    x = jax.random.uniform(key, (B, C, H, W), dtype=jnp.float32,
                           minval=-0.25, maxval=1.25)

    out = jax.block_until_ready(input_normalize(x, new_mean, new_std))

    # Reference check in plain JAX (mirrors the PyTorch forward exactly).
    ref = (jnp.clip(x, 0.0, 1.0) - new_mean[None, :, None, None]) \
          / new_std[None, :, None, None]
    assert out.shape == (B, C, H, W)
    assert jnp.allclose(out, ref, atol=1e-5, rtol=1e-5), \
        float(jnp.max(jnp.abs(out - ref)))

    print("KERNEL_OK")
</pallas_src>

<mosaic_0001>
module attributes {stable_mosaic.version = 11 : i64} {
  func.func @_normalize_kernel(%arg0: i32, %arg1: i32, %arg2: memref<8x256xf32, #tpu.memory_space<vmem>>, %arg3: memref<8x2xf32, #tpu.memory_space<vmem>>, %arg4: memref<8x256xf32, #tpu.memory_space<vmem>>) attributes {dimension_semantics = [#tpu.dimension_semantics<parallel>, #tpu.dimension_semantics<parallel>], iteration_bounds = array<i64: 1, 1>, scalar_prefetch = 0 : i64, scratch_operands = 0 : i64, tpu.core_type = #tpu.core_type<tc>, window_params = [{transform_indices = @transform_0, window_bounds = array<i64: 8, 256>}, {transform_indices = @transform_1, window_bounds = array<i64: 8, 2>}, {transform_indices = @transform_2, window_bounds = array<i64: 8, 256>}]} {
    %c0 = arith.constant 0 : index
    %c0_0 = arith.constant 0 : index
    %0 = vector.load %arg2[%c0, %c0_0] : memref<8x256xf32, #tpu.memory_space<vmem>>, vector<8x256xf32>
    %cst = arith.constant 0.000000e+00 : f32
    %cst_1 = arith.constant 1.000000e+00 : f32
    %1 = vector.broadcast %cst : f32 to vector<8x256xf32>
    %2 = arith.maximumf %1, %0 : vector<8x256xf32>
    %3 = vector.broadcast %cst_1 : f32 to vector<8x256xf32>
    %4 = arith.minimumf %3, %2 : vector<8x256xf32>
    %c0_2 = arith.constant 0 : index
    %c0_3 = arith.constant 0 : index
    %5 = vector.load %arg3[%c0_2, %c0_3] : memref<8x2xf32, #tpu.memory_space<vmem>>, vector<8x1xf32>
    %c0_4 = arith.constant 0 : index
    %c1 = arith.constant 1 : index
    %6 = vector.load %arg3[%c0_4, %c1] : memref<8x2xf32, #tpu.memory_space<vmem>>, vector<8x1xf32>
    %7 = vector.broadcast %5 : vector<8x1xf32> to vector<8x256xf32>
    %8 = arith.mulf %4, %7 : vector<8x256xf32>
    %9 = vector.broadcast %6 : vector<8x1xf32> to vector<8x256xf32>
    %10 = arith.addf %8, %9 : vector<8x256xf32>
    %c0_5 = arith.constant 0 : index
    %c0_6 = arith.constant 0 : index
    %11 = vector.load %arg4[%c0_5, %c0_6] : memref<8x256xf32, #tpu.memory_space<vmem>>, vector<8x256xf32>
    tpu.vector_store %arg4[%c0_5, %c0_6], %10 {strides = array<i32>} : memref<8x256xf32, #tpu.memory_space<vmem>>, vector<8x256xf32>,
    return
  }
  func.func @transform_0(%arg0: i32, %arg1: i32) -> (i32, i32) {
    %c0_i32 = arith.constant 0 : i32
    return %arg0, %arg1 : i32, i32
  }
  func.func @transform_1(%arg0: i32, %arg1: i32) -> (i32, i32) {
    %c0_i32 = arith.constant 0 : i32
    %c0_i32_0 = arith.constant 0 : i32
    return %arg0, %c0_i32 : i32, i32
  }
  func.func @transform_2(%arg0: i32, %arg1: i32) -> (i32, i32) {
    %c0_i32 = arith.constant 0 : i32
    return %arg0, %arg1 : i32, i32
  }
}

</mosaic_0001>

<bundles_post_ra>
// kernel: tpu_custom_call.1
= control target key start
LH: loop header
LB: loop body
LE: loop exit
PB: predicated region body
PF: predicated region fallthrough
CT: control target
= control target key end

     0   :  { %7 = vsyncpa [#allocation3], 0  ;;  %s151_s0 = inlined_call_operand.hbm [shape: f32[8,256], index: 0, kind: input, shape index: {}]   ;;  %s152_s1 = inlined_call_operand.vmem [shape: f32[8,2], index: 1, kind: input, shape index: {}]   ;;  %s153_s2 = inlined_call_operand.hbm [shape: f32[8,256], index: 2, kind: output, shape index: {}]  }
   0x1   :  { %8 = vsyncpa [#allocation4], 0  ;;  %s14_s11 = sshll.u32 %s151_s0, 4  ;;  %s123_s12 = smov [#allocation2]   ;;  %s15_s11 = int_to_ptr.hbm [resolvable:$true] %s14_s11 }
   0x2   :  { %s16_s13 = sshll.u32 %s123_s12, 4  ;;  %s17_s13 = int_to_ptr.vmem [resolvable:$true] %s16_s13 }
   0x3   :  { %19 = dma.hbm_to_vmem [thread:$0]  %s15_s11, 256, %s17_s13, [#allocation3]  }
   0x4   :  { %119 = dma.done.wait [#allocation3], 256  }
   0x5   :  { %120 = vsyncadd [#allocation3], 4294967040  ;;  %v124_v0 = vmov 0   ;;  %v32_v1 = vld [vmem:[%s152_s1] sm:$0xff]  ;;  %v125_v2 = vmov 1   ;;  %v27_v4 = vld [vmem:[#allocation2 + $0x8] sm:$0xff] }
   0x6   :  { %69 = vset.pattern.permute.xlu0 %v124_v0  ;;  %v26_v3 = vld [vmem:[#allocation2] sm:$0xff]  ;;  %v29_v7 = vmax.f32 %v27_v4, 0.0  ;;  %s126_s0 = smov [#allocation5]   ;;  %s55_s19 = sshll.u32 %s153_s2, 4  ;;  %s56_s19 = int_to_ptr.hbm [resolvable:$true] %s55_s19 }
   0x7   :  { %35 = vperm.xlu0 %69, %v32_v1   ;;  %v28_v6 = vmax.f32 %v26_v3, 0.0  ;;  %s53_s16 = sshll.u32 %s126_s0, 4  ;;  %s54_s16 = int_to_ptr.vmem [resolvable:$true] %s53_s16 }
   0x8   :  { %v31_v9 = vmin.f32 %v29_v7, 1.0 }
   0x9   :  { %v30_v8 = vmin.f32 %v28_v6, 1.0 }
   0xf   :  { %70 = vset.pattern.permute.xlu0 %v125_v2 }
  0x10   :  { %41 = vperm.xlu0 %70, %v32_v1  }
  0x79   :  { %v36_v5 = vpop.permute.xlu0 %35 }
  0x7a   :  { %v38_v10 = vmul.f32 %v36_v5, %v30_v8  ;;  %v39_v11 = vmul.f32 %v36_v5, %v31_v9 }
  0x82   :  { %v42_v12 = vpop.permute.xlu0 %41 }
  0x83   :  { %v44_v13 = vadd.f32 %v42_v12, %v38_v10  ;;  %v45_v14 = vadd.f32 %v42_v12, %v39_v11 }
  0x85   :  { %46 = vst [vmem:[#allocation5] sm:$0xff] %v44_v13 }
  0x86   :  { %47 = vst [vmem:[#allocation5 + $0x8] sm:$0xff] %v45_v14 }
  0x87   :  { %58 = dma.vmem_to_hbm [thread:$0]  %s54_s16, 256, %s56_s19, [#allocation4]  }
  0x88   :  { %121 = dma.done.wait [#allocation4], 256  }
  0x89   :  { %122 = vsyncadd [#allocation4], 4294967040 }
  0x8a   :  { %63 = vsyncpa [#allocation3], 1 }
  0x8b   :  { %64 = vsyncpa [#allocation4], 1 }

</bundles_post_ra>
